<compile_context>
chip_gen: v7x
topology: tpu7x:2x2x1
jax: 0.10.0
libtpu: 0.0.40
codegen_flags: <defaults>
</compile_context>

<pallas_src>
import functools
import math

import jax
import jax.numpy as jnp
from jax import lax
from jax.experimental import pallas as pl
from jax.experimental.pallas import tpu as pltpu

_LANES = 128
_SUBLANES = 8


def _batch_topk_kernel(x_ref, o_ref, *, k_total: int, n_padded: int,
                       use_mxu_count: bool):
    """relu + global top-(k*batch) via bit-level threshold search."""
    x = x_ref[...].astype(jnp.float32)
    rows, cols = x.shape

    # relu kept only as the int32 bit pattern (monotone for non-negative
    # floats; sign bit never set).  Values are recovered by bitcast at the end.
    bits = jnp.where(x > 0.0, pltpu.bitcast(x, jnp.int32), jnp.int32(0))

    k_f = jnp.float32(k_total)

    if use_mxu_count:
        # Count on the MXU: bf16 0/1 mask @ ones column, f32 accumulate.
        # Exact: per-row partial <= cols <= 1024; total count < 2^24.
        ones_col = jnp.ones((cols, 1), jnp.bfloat16)

        def _count(mask):
            part = jnp.dot(mask.astype(jnp.bfloat16), ones_col,
                           preferred_element_type=jnp.float32)
            return jnp.sum(part)
    else:
        def _count(mask):
            return jnp.sum(mask.astype(jnp.float32))

    # ---- pass 1: k_total-th largest bit pattern (value threshold) ----------
    # Greedy MSB->LSB: largest t with count(bits >= t) >= k_total.  Also carry
    # count(bits >= t) so the tie pass can be skipped in the common case.
    def vbody(_, carry):
        t, bit, cnt_ge = carry
        cand = t | bit
        cnt = _count(bits >= cand)
        ok = cnt >= k_f
        t = jnp.where(ok, cand, t)
        cnt_ge = jnp.where(ok, cnt, cnt_ge)
        return t, lax.shift_right_logical(bit, jnp.int32(1)), cnt_ge

    t, _, cnt_ge = lax.fori_loop(
        0, 31, vbody,
        (jnp.int32(0), jnp.int32(1 << 30), jnp.float32(n_padded)))

    vals = pltpu.bitcast(bits, jnp.float32)   # == relu(x), f32
    has_surplus = cnt_ge > k_f                # extra tied elements at t?

    @pl.when(jnp.logical_not(has_surplus))
    def _():
        # Exactly k_total elements are >= t: no tie-breaking needed.
        o_ref[...] = jnp.where(bits >= t, vals, 0.0).astype(o_ref.dtype)

    @pl.when(has_surplus)
    def _():
        # ---- pass 2 (rare): exact tie fix-up, lowest flat index wins --------
        gt = bits > t
        eq = bits == t
        need_eq = k_f - _count(gt)            # tied elements to keep (>= 1)

        row_idx = lax.broadcasted_iota(jnp.int32, (rows, cols), 0)
        col_idx = lax.broadcasted_iota(jnp.int32, (rows, cols), 1)
        flat_idx = row_idx * cols + col_idx

        idx_bits = max(1, int(n_padded).bit_length())

        # Largest T with count(eq & flat_idx < T) <= need_eq; flat indices are
        # unique, so exactly need_eq tied elements (lowest indices) are kept.
        def ibody(_, carry):
            T, bit = carry
            cand = T | bit
            cnt = _count(eq & (flat_idx < cand))
            T = jnp.where(cnt <= need_eq, cand, T)
            return T, lax.shift_right_logical(bit, jnp.int32(1))

        T, _ = lax.fori_loop(0, idx_bits, ibody,
                             (jnp.int32(0), jnp.int32(1 << (idx_bits - 1))))

        keep = gt | (eq & (flat_idx < T))
        o_ref[...] = jnp.where(keep, vals, 0.0).astype(o_ref.dtype)


@functools.cache
def _vmem_cap_bytes() -> int:
    try:
        return int(pltpu.get_tpu_info().vmem_capacity_bytes)
    except Exception:
        return 64 << 20   # conservative fallback: v7x physical VMEM


@functools.cache
def _use_mxu_count() -> bool:
    try:
        kind = jax.devices()[0].device_kind.lower()
    except Exception:
        return False
    if "tpu" not in kind:
        return False
    # v5e and older: keep the plain VPU f32 sum (no bf16 VPU path).
    return not any(v in kind for v in ("v2", "v3", "v4", "v5"))


def _pick_layout(n: int) -> tuple[int, int]:
    """Smallest lane/sublane-dense (rows, cols) slab holding n elements."""
    best = None
    for cols in (128, 256, 512, 1024):
        rows = -(-n // cols)
        rows = -(-rows // _SUBLANES) * _SUBLANES
        key = (rows * cols, -cols)            # least padding, then widest lanes
        if best is None or key < best[0]:
            best = (key, rows, cols)
    _, rows, cols = best
    return rows, cols


def batch_topk(x: jax.Array, k: int) -> jax.Array:
    """BatchTopK.forward: keep the global top (k * batch) relu'd activations."""
    batch = x.shape[0]
    n = int(math.prod(x.shape))
    k_total = int(k) * int(batch)

    rows, cols = _pick_layout(n)
    n_padded = rows * cols
    # f32 count accumulation / index search require n_padded < 2^24 — always
    # true for anything that fits a single VMEM block.
    assert n_padded < (1 << 24), "single-block path limited to < 2^24 elements"

    flat = x.reshape(-1)
    padded = n_padded > n
    if padded:
        # Zero padding is inert: it can only be "selected" when the threshold
        # is zero, and then it contributes zeros to the output anyway.
        flat = jnp.pad(flat, (0, n_padded - n))
    x2 = flat.reshape(rows, cols)

    kernel = functools.partial(
        _batch_topk_kernel, k_total=k_total, n_padded=n_padded,
        use_mxu_count=_use_mxu_count())

    # Working set ~ input + bits + output + one mask temp + slack.
    needed = n_padded * 24 + (2 << 20)
    cap = max(_vmem_cap_bytes() - (8 << 20), 32 << 20)
    vmem_limit = int(min(max(needed, 32 << 20), cap))
    # TODO(synk): if `needed` exceeds `cap` (≈3.5M elements on v7x), a tiled
    # radix-select path is required; this single-block path will not compile.

    out2 = pl.pallas_call(
        kernel,
        out_shape=jax.ShapeDtypeStruct((rows, cols), x.dtype),
        in_specs=[pl.BlockSpec(memory_space=pltpu.MemorySpace.VMEM)],
        out_specs=pl.BlockSpec(memory_space=pltpu.MemorySpace.VMEM),
        compiler_params=pltpu.CompilerParams(vmem_limit_bytes=vmem_limit),
        # The padded slab is a wrapper-only temporary -> safe to reuse its HBM
        # buffer for the output.  (Skip when x2 may alias the caller's x.)
        input_output_aliases=({0: 0} if padded else {}),
    )(x2)

    return out2.reshape(-1)[:n].reshape(x.shape)


def _reference(x: jax.Array, k: int) -> jax.Array:
    """Pure-JAX reference mirroring the PyTorch code path."""
    acts = jnp.maximum(x, 0.0)
    flat = acts.reshape(-1)
    vals, idxs = lax.top_k(flat, k * x.shape[0])
    out = jnp.zeros_like(flat).at[idxs].set(vals)
    return out.reshape(acts.shape)


if __name__ == "__main__":
    key = jax.random.PRNGKey(0)
    k1, k2, k3, k4 = jax.random.split(key, 4)

    # Case 1: (batch=2, channels=4, spatial=16x16), k=8 -> keep 16 globally.
    x1 = jax.random.normal(k1, (2, 4, 16, 16), dtype=jnp.float32)
    out1 = batch_topk(x1, 8)
    jax.block_until_ready(out1)
    ref1 = _reference(x1, 8)
    assert out1.shape == x1.shape and out1.dtype == x1.dtype
    assert jnp.allclose(out1, ref1, atol=1e-6), "case 1 mismatch vs reference"
    assert int(jnp.sum(out1 != 0)) == 8 * 2

    # Case 2: non-multiple-of-128 feature dim (exercises padding + aliasing).
    x2 = jax.random.normal(k2, (4, 300), dtype=jnp.float32)
    out2 = batch_topk(x2, 5)
    jax.block_until_ready(out2)
    ref2 = _reference(x2, 5)
    assert jnp.allclose(out2, ref2, atol=1e-6), "case 2 mismatch vs reference"
    assert int(jnp.sum(out2 != 0)) == 5 * 4

    # Case 3: fewer positives than k*batch (exercises the rare tie branch).
    x3 = -jnp.abs(jax.random.normal(k3, (2, 64), dtype=jnp.float32))
    x3 = x3.at[0, 3].set(1.5).at[1, 10].set(0.75).at[0, 40].set(2.25)
    out3 = batch_topk(x3, 4)  # k*batch = 8 > 3 positives
    jax.block_until_ready(out3)
    ref3 = _reference(x3, 4)
    assert jnp.allclose(out3, ref3, atol=1e-6), "case 3 mismatch vs reference"
    assert int(jnp.sum(out3 != 0)) == 3

    # Case 4: SAE-like shape (batch=8, hidden=4096), k=32 -> keep 256 globally.
    x4 = jax.random.normal(k4, (8, 4096), dtype=jnp.float32)
    out4 = batch_topk(x4, 32)
    jax.block_until_ready(out4)
    ref4 = _reference(x4, 32)
    assert jnp.allclose(out4, ref4, atol=1e-6), "case 4 mismatch vs reference"
    assert int(jnp.sum(out4 != 0)) == 32 * 8

    print("KERNEL_OK")
</pallas_src>

<mosaic_0001>
module attributes {stable_mosaic.version = 11 : i64} {
  func.func @_batch_topk_kernel(%arg0: memref<8x256xf32, #tpu.memory_space<vmem>>, %arg1: memref<8x256xf32, #tpu.memory_space<vmem>>) attributes {dimension_semantics = [], scalar_prefetch = 0 : i64, scratch_operands = 0 : i64, tpu.core_type = #tpu.core_type<tc>} {
    %c0 = arith.constant 0 : index
    %c0_0 = arith.constant 0 : index
    %0 = vector.load %arg0[%c0, %c0_0] : memref<8x256xf32, #tpu.memory_space<vmem>>, vector<8x256xf32>
    %cst = arith.constant 0.000000e+00 : f32
    %1 = vector.broadcast %cst : f32 to vector<8x256xf32>
    %2 = arith.cmpf ogt, %0, %1 : vector<8x256xf32>
    %3 = tpu.bitcast %0 : vector<8x256xf32> -> vector<8x256xi32>
    %c0_i32 = arith.constant 0 : i32
    %4 = vector.broadcast %c0_i32 : i32 to vector<8x256xi32>
    %5 = arith.select %2, %3, %4 : vector<8x256xi1>, vector<8x256xi32>
    %cst_1 = arith.constant 1.600000e+01 : f32
    %c0_i32_2 = arith.constant 0 : i32
    %c1073741824_i32 = arith.constant 1073741824 : i32
    %cst_3 = arith.constant 2.048000e+03 : f32
    %c0_i32_4 = arith.constant 0 : i32
    %c31_i32 = arith.constant 31 : i32
    %6 = arith.addi %c0_i32_4, %c31_i32 : i32
    %c1_i32 = arith.constant 1 : i32
    %7:3 = scf.for %arg2 = %c0_i32_4 to %6 step %c1_i32 iter_args(%arg3 = %c0_i32_2, %arg4 = %c1073741824_i32, %arg5 = %cst_3) -> (i32, i32, f32)  : i32 {
      %15 = arith.ori %arg3, %arg4 : i32
      %16 = vector.broadcast %15 : i32 to vector<8x256xi32>
      %17 = arith.cmpi sge, %5, %16 : vector<8x256xi32>
      %18 = arith.extui %17 : vector<8x256xi1> to vector<8x256xi32>
      %19 = arith.sitofp %18 : vector<8x256xi32> to vector<8x256xf32>
      %20 = vector.shape_cast %19 : vector<8x256xf32> to vector<1x8x256xf32>
      %cst_9 = arith.constant dense<0.000000e+00> : vector<1xf32>
      %21 = vector.multi_reduction <add>, %20, %cst_9 [1, 2] : vector<1x8x256xf32> to vector<1xf32>
      %22 = vector.shape_cast %21 : vector<1xf32> to vector<1x1x1xf32>
      %23 = vector.extract %22[0, 0, 0] : f32 from vector<1x1x1xf32>
      %24 = arith.cmpf oge, %23, %cst_1 : f32
      %25 = arith.select %24, %15, %arg3 : i32
      %26 = arith.select %24, %23, %arg5 : f32
      %c1_i32_10 = arith.constant 1 : i32
      %27 = arith.shrui %arg4, %c1_i32_10 : i32
      scf.yield %25, %27, %26 : i32, i32, f32
    }
    %8 = tpu.bitcast %5 : vector<8x256xi32> -> vector<8x256xf32>
    %cst_5 = arith.constant 1.600000e+01 : f32
    %9 = arith.cmpf ogt, %7#2, %cst_5 : f32
    %true = arith.constant true
    %10 = arith.xori %9, %true : i1
    %11 = arith.extui %10 : i1 to i32
    %c0_i32_6 = arith.constant 0 : i32
    %12 = arith.cmpi ne, %11, %c0_i32_6 : i32
    scf.if %12 {
      %15 = vector.broadcast %7#0 : i32 to vector<8x256xi32>
      %16 = arith.cmpi sge, %5, %15 : vector<8x256xi32>
      %cst_9 = arith.constant 0.000000e+00 : f32
      %17 = vector.broadcast %cst_9 : f32 to vector<8x256xf32>
      %18 = arith.select %16, %8, %17 : vector<8x256xi1>, vector<8x256xf32>
      %c0_10 = arith.constant 0 : index
      %c0_11 = arith.constant 0 : index
      %19 = vector.load %arg1[%c0_10, %c0_11] : memref<8x256xf32, #tpu.memory_space<vmem>>, vector<8x256xf32>
      tpu.vector_store %arg1[%c0_10, %c0_11], %18 {strides = array<i32>} : memref<8x256xf32, #tpu.memory_space<vmem>>, vector<8x256xf32>,
    } else {
    }
    %13 = arith.extui %9 : i1 to i32
    %cst_7 = arith.constant 1.600000e+01 : f32
    %c0_i32_8 = arith.constant 0 : i32
    %14 = arith.cmpi ne, %13, %c0_i32_8 : i32
    scf.if %14 {
      %15 = vector.broadcast %7#0 : i32 to vector<8x256xi32>
      %16 = arith.cmpi sgt, %5, %15 : vector<8x256xi32>
      %17 = vector.broadcast %7#0 : i32 to vector<8x256xi32>
      %18 = arith.cmpi eq, %5, %17 : vector<8x256xi32>
      %19 = arith.extui %16 : vector<8x256xi1> to vector<8x256xi32>
      %20 = arith.sitofp %19 : vector<8x256xi32> to vector<8x256xf32>
      %21 = vector.shape_cast %20 : vector<8x256xf32> to vector<1x8x256xf32>
      %cst_9 = arith.constant dense<0.000000e+00> : vector<1xf32>
      %22 = vector.multi_reduction <add>, %21, %cst_9 [1, 2] : vector<1x8x256xf32> to vector<1xf32>
      %23 = vector.shape_cast %22 : vector<1xf32> to vector<1x1x1xf32>
      %24 = vector.extract %23[0, 0, 0] : f32 from vector<1x1x1xf32>
      %25 = arith.subf %cst_7, %24 : f32
      %26 = tpu.iota {dimensions = array<i32: 0>} : vector<8x256xi32>
      %27 = tpu.iota {dimensions = array<i32: 1>} : vector<8x256xi32>
      %c256_i32 = arith.constant 256 : i32
      %28 = vector.broadcast %c256_i32 : i32 to vector<8x256xi32>
      %29 = arith.muli %26, %28 : vector<8x256xi32>
      %30 = arith.addi %29, %27 : vector<8x256xi32>
      %c0_i32_10 = arith.constant 0 : i32
      %c2048_i32 = arith.constant 2048 : i32
      %c0_i32_11 = arith.constant 0 : i32
      %c12_i32 = arith.constant 12 : i32
      %31 = arith.addi %c0_i32_11, %c12_i32 : i32
      %c1_i32_12 = arith.constant 1 : i32
      %32:2 = scf.for %arg2 = %c0_i32_11 to %31 step %c1_i32_12 iter_args(%arg3 = %c0_i32_10, %arg4 = %c2048_i32) -> (i32, i32)  : i32 {
        %40 = arith.ori %arg3, %arg4 : i32
        %41 = vector.broadcast %40 : i32 to vector<8x256xi32>
        %42 = arith.cmpi slt, %30, %41 : vector<8x256xi32>
        %43 = arith.andi %18, %42 : vector<8x256xi1>
        %44 = arith.extui %43 : vector<8x256xi1> to vector<8x256xi32>
        %45 = arith.sitofp %44 : vector<8x256xi32> to vector<8x256xf32>
        %46 = vector.shape_cast %45 : vector<8x256xf32> to vector<1x8x256xf32>
        %cst_16 = arith.constant dense<0.000000e+00> : vector<1xf32>
        %47 = vector.multi_reduction <add>, %46, %cst_16 [1, 2] : vector<1x8x256xf32> to vector<1xf32>
        %48 = vector.shape_cast %47 : vector<1xf32> to vector<1x1x1xf32>
        %49 = vector.extract %48[0, 0, 0] : f32 from vector<1x1x1xf32>
        %50 = arith.cmpf ole, %49, %25 : f32
        %51 = arith.select %50, %40, %arg3 : i32
        %c1_i32_17 = arith.constant 1 : i32
        %52 = arith.shrui %arg4, %c1_i32_17 : i32
        scf.yield %51, %52 : i32, i32
      }
      %33 = vector.broadcast %32#0 : i32 to vector<8x256xi32>
      %34 = arith.cmpi slt, %30, %33 : vector<8x256xi32>
      %35 = arith.andi %18, %34 : vector<8x256xi1>
      %36 = arith.ori %16, %35 : vector<8x256xi1>
      %cst_13 = arith.constant 0.000000e+00 : f32
      %37 = vector.broadcast %cst_13 : f32 to vector<8x256xf32>
      %38 = arith.select %36, %8, %37 : vector<8x256xi1>, vector<8x256xf32>
      %c0_14 = arith.constant 0 : index
      %c0_15 = arith.constant 0 : index
      %39 = vector.load %arg1[%c0_14, %c0_15] : memref<8x256xf32, #tpu.memory_space<vmem>>, vector<8x256xf32>
      tpu.vector_store %arg1[%c0_14, %c0_15], %38 {strides = array<i32>} : memref<8x256xf32, #tpu.memory_space<vmem>>, vector<8x256xf32>,
    } else {
    }
    return
  }
}

</mosaic_0001>

<bundles_post_ra>
// kernel: tpu_custom_call.1
= control target key start
LH: loop header
LB: loop body
LE: loop exit
PB: predicated region body
PF: predicated region fallthrough
CT: control target
= control target key end

     0   :  { %6 = vsyncpa [#allocation3], 0  ;;  %s501_s0 = inlined_call_operand.hbm [shape: f32[8,256], index: 0, kind: input, shape index: {}]   ;;  %s502_s1 = inlined_call_operand.hbm [shape: f32[8,256], index: 1, kind: output, shape index: {}]  }
   0x1   :  { %7 = vsyncpa [#allocation4], 0  ;;  %s363_s6 = smov [#allocation2]   ;;  %s259_s10 = scalar_lea.hbm %s501_s0, 256 }
   0x2   :  { %s14_s7 = sshll.u32 %s363_s6, 4  ;;  %p260_p0 = scmp.ne.s32.totalorder %s501_s0, %s259_s10  ;;  %s15_s7 = int_to_ptr.vmem [resolvable:$true] %s14_s7 }
   0x3   :  { %p263_p1 = scmp.lt.u32.totalorder %s259_s10, %s501_s0 }
   0x5   :  { %p265_p2 = pnand %p263_p1, %p260_p0 }
   0x7   :  { %268 = shalt.err (!%p265_p2)
}
   0x8   :  { %s269_s15 = scalar_lea.vmem %s15_s7, 256  ;;  %p274_p4 = scmp.lt.s32.totalorder %s15_s7, %s15_s7 }
   0x9   :  { %p270_p3 = scmp.ne.s32.totalorder %s15_s7, %s269_s15  ;;  %p275_p5 = scmp.lt.s32.totalorder %s269_s15, %s269_s15 }
   0xb   :  { %p276_p6 = por %p275_p5, %p274_p4 }
   0xd   :  { %p277_p7 = pnand %p276_p6, %p270_p3 }
   0xf   :  { %280 = shalt.err (!%p277_p7)
}
  0x10   :  { %17 = dma.hbm_to_vmem [thread:$0]  %s501_s0, 256, %s15_s7, [#allocation3]  }
  0x11   :  { %331 = dma.done.wait [#allocation3], 256  }
  0x12   :  { %332 = vsyncadd [#allocation3], 4294967040  ;;  %v21_v0 = vld [vmem:[#allocation2] sm:$0xff]  ;;  %v22_v1 = vld [vmem:[#allocation2 + $0x8] sm:$0xff]  ;;  %s394_s18 = smov 2048.0   ;;  %s396_s19 = smov 1073741824  }
  0x13   :  { %vm23_vm0 = vcmp.gt.f32.partialorder %v21_v0, 0.0  ;;  %vm24_vm1 = vcmp.gt.f32.partialorder %v22_v1, 0.0  ;;  %s398_s20 = smov 0   ;;  %s400_s21 = smov 0  }
  0x14   :  { %v390_v2 = vsel %vm23_vm0, %v21_v0, 0  ;;  %v392_v3 = vsel %vm24_vm1, %v22_v1, 0 }
  0x15 LB: > { %s38_s0 = sor.u32 %s341_s19, %s345_s20  ;;  %s59_s19 = sshrl.u32 %s341_s19, 1   ;;  %v364_v5 = vmov 0.0   ;;  %s349_s21 = sphi %s400_s21, %s34_s21   ;;  %s345_s20 = sphi %s398_s20, %s504_s20   ;;  %s341_s19 = sphi %s396_s19, %s59_s19   ;;  %s337_s18 = sphi %s394_s18, %s503_s18  }
  0x16   : > { %v39_v4 = vstv %s38_s0  ;;  %s34_s21 = sadd.s32 1, %s349_s21  }
  0x17   : > { %vm40_vm2 = vcmp.ge.s32.totalorder %v390_v2, %v39_v4  ;;  %vm41_vm3 = vcmp.ge.s32.totalorder %v392_v3, %v39_v4  ;;  %p31_p9 = scmp.ge.s32.totalorder %s34_s21, 31  }
  0x18   : > { %v186_v6 = vsel %vm40_vm2, 1.0, %v364_v5  ;;  %v187_v7 = vsel %vm41_vm3, 1.0, %v364_v5 }
  0x19   : > { %v46_v8 = vadd.f32 %v187_v7, %v186_v6 }
  0x1b   : > { %47 = vadd.xlane.f32.xlu0 %v46_v8 }
  0xa8   : > { %v48_v9 = vpop.xlane.xlu0 %47 }
  0xa9   : > { %v49_v10 = vrot.slane %v48_v9, 4 }
  0xab   : > { %v50_v11 = vadd.f32 %v49_v10, %v48_v9 }
  0xad   : > { %v51_v12 = vrot.slane %v50_v11, 2 }
  0xaf   : > { %v52_v13 = vadd.f32 %v51_v12, %v50_v11 }
  0xb1   : > { %v53_v14 = vrot.slane %v52_v13, 1 }
  0xb3   : > { %v54_v15 = vadd.f32 %v53_v14, %v52_v13 }
  0xb5   : > { %192 = vpush %v54_v15 }
  0xe4   :  { %33 = sbr.rel (!%p31_p9) target bundleno = 21 (0x15), region = 50 }
  0xe6   : > { %s193_s22 = spop %192 }
  0xe7   : > { %p56_p8 = scmp.ge.f32.partialorder %s193_s22, 16.0 }
  0xe9   : > { %s507_s0 = smov (!%p56_p8, %s38_s0), %s345_s20  ;;  %s509_s22 = smov (!%p56_p8, %s193_s22), %s337_s18 }
  0xea   : > { %s503_s18 = smov %s509_s22  ;;  %s504_s20 = smov %s507_s0 }
  0xeb   :  { %p62_p10 = scmp.gt.f32.partialorder %s509_s22, 16.0 }
  0xec   :  { %v426_v16 = vstv (%p62_p10), %s507_s0  ;;  %v365_v17 = vmov (%p62_p10), 0.0   ;;  %v86_v21 = vlaneseq (%p62_p10)  ;;  %s445_s25 = smov (%p62_p10), 2048   ;;  %s447_s26 = smov (%p62_p10), 0  }
  0xed   :  { %65 = sbr.rel (!%p62_p10) target bundleno = 669 (0x29d), region = 20  ;;  %vm67_vm4 = vcmp.gt.s32.totalorder (%p62_p10), %v390_v2, %v426_v16  ;;  %vm68_vm5 = vcmp.gt.s32.totalorder (%p62_p10), %v392_v3, %v426_v16  ;;  %vm69_vm6 = vcmp.eq.s32.totalorder (%p62_p10), %v390_v2, %v426_v16  ;;  %vm70_vm7 = vcmp.eq.s32.totalorder (%p62_p10), %v392_v3, %v426_v16  ;;  %s449_s27 = smov (%p62_p10), 0  }
  0xee   :  { %v188_v18 = vsel (%p62_p10), %vm67_vm4, 1.0, %v365_v17  ;;  %v189_v19 = vsel (%p62_p10), %vm68_vm5, 1.0, %v365_v17  ;;  %v87_v22 = vshrl.u32 (%p62_p10), %v86_v21, 7  ;;  %v89_v23 = vand.u32 (%p62_p10), 127, %v86_v21 }
  0xef   :  { %v75_v20 = vadd.f32 (%p62_p10), %v189_v19, %v188_v18 }
  0xf0   :  { %v90_v24 = vadd.s32 (%p62_p10), 128, %v89_v23  ;;  %v91_v25 = vmul.u32 (%p62_p10), 256, %v87_v22 }
  0xf1   :  { %76 = vadd.xlane.f32.xlu0 (%p62_p10), %v75_v20 }
  0xf2   :  { %v92_v26 = vadd.s32 (%p62_p10), %v91_v25, %v89_v23  ;;  %v93_v27 = vadd.s32 (%p62_p10), %v91_v25, %v90_v24 }
 0x17e   :  { %v77_v28 = vpop.xlane.xlu0 %76 }
 0x17f   :  { %v78_v29 = vrot.slane %v77_v28, 4 }
 0x181   :  { %v79_v30 = vadd.f32 %v78_v29, %v77_v28 }
 0x183   :  { %v80_v31 = vrot.slane %v79_v30, 2 }
 0x185   :  { %v81_v32 = vadd.f32 %v80_v31, %v79_v30 }
 0x187   :  { %v82_v33 = vrot.slane %v81_v32, 1 }
 0x189   :  { %v83_v34 = vadd.f32 %v82_v33, %v81_v32 }
 0x18b   :  { %194 = vpush %v83_v34 }
 0x1bc   :  { %s442_s23 = spop %194 }
 0x1bd   :  { %s85_s24 = ssub.f32 16.0, %s442_s23 }
 0x1be LB: > { %s102_s28 = sor.u32 %s353_s25, %s357_s26  ;;  %s124_s25 = sshrl.u32 %s353_s25, 1   ;;  %v366_v36 = vmov 0.0   ;;  %s361_s27 = sphi %s449_s27, %s99_s27   ;;  %s357_s26 = sphi %s447_s26, %s505_s26   ;;  %s353_s25 = sphi %s445_s25, %s124_s25  }
 0x1bf   : > { %v103_v35 = vstv %s102_s28  ;;  %s99_s27 = sadd.s32 1, %s361_s27  }
 0x1c0   : > { %vm104_vm8 = vcmp.lt.s32.totalorder %v92_v26, %v103_v35  ;;  %vm105_vm9 = vcmp.lt.s32.totalorder %v93_v27, %v103_v35  ;;  %p96_p12 = scmp.ge.s32.totalorder %s99_s27, 12  }
 0x1c1   : > { %vm106_vm10 = vmand %vm69_vm6, %vm104_vm8 }
 0x1c2   : > { %vm107_vm11 = vmand %vm70_vm7, %vm105_vm9  ;;  %v190_v37 = vsel %vm106_vm10, 1.0, %v366_v36 }
 0x1c3   : > { %v191_v38 = vsel %vm107_vm11, 1.0, %v366_v36 }
 0x1c4   : > { %v112_v39 = vadd.f32 %v191_v38, %v190_v37 }
 0x1c6   : > { %113 = vadd.xlane.f32.xlu0 %v112_v39 }
 0x253   : > { %v114_v40 = vpop.xlane.xlu0 %113 }
 0x254   : > { %v115_v41 = vrot.slane %v114_v40, 4 }
 0x256   : > { %v116_v42 = vadd.f32 %v115_v41, %v114_v40 }
 0x258   : > { %v117_v43 = vrot.slane %v116_v42, 2 }
 0x25a   : > { %v118_v44 = vadd.f32 %v117_v43, %v116_v42 }
 0x25c   : > { %v119_v45 = vrot.slane %v118_v44, 1 }
 0x25e   : > { %v120_v46 = vadd.f32 %v119_v45, %v118_v44 }
 0x260   : > { %196 = vpush %v120_v46 }
 0x28f   :  { %98 = sbr.rel (!%p96_p12) target bundleno = 446 (0x1be), region = 61 }
 0x291   : > { %s197_s29 = spop %196 }
 0x292   : > { %p122_p11 = scmp.le.f32.partialorder %s197_s29, %s85_s24 }
 0x294   : > { %s511_s28 = smov (!%p122_p11, %s102_s28), %s357_s26 }
 0x295   : > { %s505_s26 = smov %s511_s28  ;;  %v125_v47 = vstv (%p96_p12), %s511_s28 }
 0x296   :  { %vm126_vm12 = vcmp.lt.s32.totalorder %v92_v26, %v125_v47  ;;  %vm127_vm13 = vcmp.lt.s32.totalorder %v93_v27, %v125_v47 }
 0x297   :  { %vm128_vm14 = vmand %vm69_vm6, %vm126_vm12 }
 0x298   :  { %vm130_vm15 = vmor %vm67_vm4, %vm128_vm14 }
 0x299   :  { %v132_v48 = vsel %vm130_vm15, %v390_v2, 0.0  ;;  %vm129_vm0 = vmand %vm70_vm7, %vm127_vm13 }
 0x29a   :  { %134 = vst [vmem:[#allocation5] sm:$0xff] %v132_v48  ;;  %vm131_vm1 = vmor %vm68_vm5, %vm129_vm0 }
 0x29b   :  { %v133_v49 = vsel %vm131_vm1, %v392_v3, 0.0 }
 0x29c   :  { %135 = vst [vmem:[#allocation5 + $0x8] sm:$0xff] %v133_v49 }
 0x29d PF:  { %138 = sbr.rel (%p62_p10) target bundleno = 676 (0x2a4), region = 31  ;;  %v139_v50 = vstv (!%p62_p10), %s507_s0 }
 0x29e   :  { %vm140_vm2 = vcmp.ge.s32.totalorder (!%p62_p10), %v390_v2, %v139_v50  ;;  %vm141_vm3 = vcmp.ge.s32.totalorder (!%p62_p10), %v392_v3, %v139_v50 }
 0x29f   :  { %v142_v51 = vsel (!%p62_p10), %vm140_vm2, %v390_v2, 0.0  ;;  %v143_v52 = vsel (!%p62_p10), %vm141_vm3, %v392_v3, 0.0 }
 0x2a0   :  { %144 = vst [vmem:[#allocation5] sm:$0xff] (!%p62_p10), %v142_v51  ;;  %145 = vst [vmem:[#allocation5 + $0x8] sm:$0xff] (!%p62_p10), %v143_v52 }
 0x2a4 PF:  { %s367_s30 = smov [#allocation5]  }
 0x2a5   :  { %s152_s2 = sshll.u32 %s367_s30, 4  ;;  %s153_s2 = int_to_ptr.vmem [resolvable:$true] %s152_s2 }
 0x2a6   :  { %s281_s3 = scalar_lea.vmem %s153_s2, 256  ;;  %p286_p0 = scmp.lt.s32.totalorder %s153_s2, %s153_s2 }
 0x2a7   :  { %p282_p13 = scmp.ne.s32.totalorder %s153_s2, %s281_s3  ;;  %p287_p1 = scmp.lt.s32.totalorder %s281_s3, %s281_s3 }
 0x2a9   :  { %p288_p2 = por %p287_p1, %p286_p0 }
 0x2ab   :  { %p289_p3 = pnand %p288_p2, %p282_p13 }
 0x2ad   :  { %292 = shalt.err (!%p289_p3)
}
 0x2ae   :  { %s293_s6 = scalar_lea.hbm %s502_s1, 256 }
 0x2af   :  { %p294_p4 = scmp.ne.s32.totalorder %s502_s1, %s293_s6  ;;  %p297_p5 = scmp.lt.u32.totalorder %s293_s6, %s502_s1 }
 0x2b1   :  { %p299_p6 = pnand %p297_p5, %p294_p4 }
 0x2b3   :  { %302 = shalt.err (!%p299_p6)
}
 0x2b4   :  { %155 = dma.vmem_to_hbm [thread:$0]  %s153_s2, 256, %s502_s1, [#allocation4]  }
 0x2b5   :  { %333 = dma.done.wait [#allocation4], 256  }
 0x2b6   :  { %334 = vsyncadd [#allocation4], 4294967040 }
 0x2b7   :  { %159 = vsyncpa [#allocation3], 1 }
 0x2b8   :  { %160 = vsyncpa [#allocation4], 1 }

</bundles_post_ra>
